<compile_context>
chip_gen: v6e
topology: v6e:2x2x1
jax: 0.10.0
libtpu: 0.0.40
codegen_flags: <defaults>
</compile_context>

<pallas_src>
import jax
import jax.numpy as jnp
from jax.experimental import pallas as pl
from jax.experimental.pallas import tpu as pltpu

LANES = 128
MAX_BLOCK_ROWS = 1024  # (1024, 128) f32 block = 512 KiB/buffer -> safe on v7x's 64 MiB VMEM


def _obs_noise_kernel(params_ref, x_ref, o_ref):
    """Keep x where hash(global_index, seed) < threshold, else zero.

    params_ref : SMEM uint32[2] — (seed, keep_threshold)   threshold = probs * 2^32
    x_ref      : VMEM [block_rows, 128] tile of x (native dtype)
    o_ref      : VMEM [block_rows, 128] output tile (native dtype)
    """
    rows, lanes = x_ref.shape
    seed = params_ref[0]
    thresh = params_ref[1]

    # Global element counter for this tile: (block_row_offset + row) * 128 + lane.
    # Using the global index makes every grid block's random stream distinct.
    base = pl.program_id(0) * rows
    row_ids = jax.lax.broadcasted_iota(jnp.int32, (rows, lanes), 0)
    lane_ids = jax.lax.broadcasted_iota(jnp.int32, (rows, lanes), 1)
    ctr = (base + row_ids) * lanes + lane_ids

    # Counter-based integer hash ("lowbias32") -> uniform uint32 per element.
    h = ctr.astype(jnp.uint32) ^ seed
    h = h ^ (h >> 16)
    h = h * jnp.uint32(0x7FEB352D)
    h = h ^ (h >> 15)
    h = h * jnp.uint32(0x846CA68B)
    h = h ^ (h >> 16)

    keep = h < thresh  # P(keep) = thresh / 2^32
    x = x_ref[...]
    o_ref[...] = jnp.where(keep, x, jnp.zeros_like(x))


@jax.jit
def obs_noise_forward(x, probs, seed):
    """Pallas equivalent of _ObsNoise.forward.

    x     : array of any shape / dtype (NCHW obs here), kept in native dtype
    probs : keep probability (= 1 - p_noise)
    seed  : integer randomness source (the PyTorch module draws fresh RNG each
            forward; here callers must vary `seed` per step)
    """
    orig_shape = x.shape
    n = x.size

    probs = jnp.asarray(probs, jnp.float32)
    seed_u32 = jnp.asarray(seed).astype(jnp.uint32)
    # keep iff hash < thresh; thresh = probs * 2^32, clamped into uint32 range.
    scaled = jnp.clip(probs, 0.0, 1.0) * jnp.float32(4294967296.0)
    thresh_mid = jnp.minimum(scaled, jnp.float32(4294967040.0)).astype(jnp.uint32)
    thresh = jnp.where(probs >= 1.0, jnp.uint32(0xFFFFFFFF), thresh_mid)
    params = jnp.stack([seed_u32, thresh])  # uint32[2] -> SMEM

    # View as a lane-dense (rows, 128) slab in native dtype; pad only for the
    # rare ragged case (numel % 128 != 0).
    if n % LANES == 0:
        pad = 0
        x2d = x.reshape(n // LANES, LANES)
    else:
        pad = (-n) % LANES
        x2d = jnp.pad(x.reshape(-1), (0, pad)).reshape(-1, LANES)

    rows = x2d.shape[0]
    block_rows = rows if rows <= MAX_BLOCK_ROWS else MAX_BLOCK_ROWS
    grid = (pl.cdiv(rows, block_rows),)

    out2d = pl.pallas_call(
        _obs_noise_kernel,
        out_shape=jax.ShapeDtypeStruct(x2d.shape, x2d.dtype),
        grid=grid,
        in_specs=[
            pl.BlockSpec(memory_space=pltpu.MemorySpace.SMEM),       # params
            pl.BlockSpec((block_rows, LANES), lambda i: (i, 0)),     # x tile
        ],
        out_specs=pl.BlockSpec((block_rows, LANES), lambda i: (i, 0)),
        compiler_params=pltpu.CompilerParams(
            dimension_semantics=("parallel",)),                      # 2 TCs on v7x
    )(params, x2d)

    if pad:
        return out2d.reshape(-1)[:n].reshape(orig_shape)
    return out2d.reshape(orig_shape)


class ObsNoise:
    """JAX/Pallas port of _ObsNoise (no gradients, scalar `probs` parameter)."""

    def __init__(self, p_noise, observation_space=None):
        # nn.Parameter(torch.tensor(0.0)) then fill_(1.0 - p_noise)
        self.probs = jnp.float32(1.0 - p_noise)

    def is_active(self):
        return bool(self.probs != 1.0)

    def fill_p_noise_(self, p_noise):
        self.probs = jnp.float32(1.0 - p_noise)

    def __call__(self, x, seed=0):
        # Fast path: noise disabled -> identity, skip the HBM round trip.
        if float(self.probs) == 1.0:
            return x
        # TODO(synk): PyTorch draws fresh randomness from the global RNG every
        # forward; here the caller must supply a per-step seed.
        return obs_noise_forward(x, self.probs, seed)


if __name__ == "__main__":
    key = jax.random.PRNGKey(0)
    # small NCHW observation batch
    x = jax.random.normal(key, (2, 4, 16, 16), dtype=jnp.float32)

    p_noise = 0.25  # -> keep probability probs = 0.75
    module = ObsNoise(p_noise)
    out = jax.block_until_ready(module(x, seed=7))

    # shape/dtype preserved; every output element is either x or exactly 0
    assert out.shape == x.shape and out.dtype == x.dtype
    kept = out == x
    zeroed = out == 0.0
    assert bool(jnp.all(kept | zeroed))
    frac = float(jnp.mean(kept.astype(jnp.float32)))
    assert 0.5 < frac < 0.95  # expected ~0.75

    # p_noise == 0 (probs == 1) must be the identity (fast path)
    ident = jax.block_until_ready(ObsNoise(0.0)(x, seed=3))
    assert bool(jnp.all(ident == x))

    # p_noise == 1 (probs == 0) must zero everything (through the kernel)
    zeros = jax.block_until_ready(ObsNoise(1.0)(x, seed=3))
    assert bool(jnp.all(zeros == 0.0))

    print("KERNEL_OK")
</pallas_src>

<mosaic_0001>
module attributes {stable_mosaic.version = 11 : i64} {
  func.func @_obs_noise_kernel(%arg0: i32, %arg1: memref<2xi32, #tpu.memory_space<smem>>, %arg2: memref<16x128xf32, #tpu.memory_space<vmem>>, %arg3: memref<16x128xf32, #tpu.memory_space<vmem>>) attributes {dimension_semantics = [#tpu.dimension_semantics<parallel>], iteration_bounds = array<i64: 1>, scalar_prefetch = 0 : i64, scratch_operands = 0 : i64, tpu.core_type = #tpu.core_type<tc>, window_params = [{transform_indices = @transform_0, window_bounds = array<i64: 2>}, {transform_indices = @transform_1, window_bounds = array<i64: 16, 128>}, {transform_indices = @transform_2, window_bounds = array<i64: 16, 128>}]} {
    %c0 = arith.constant 0 : index
    %0 = memref.load %arg1[%c0] : memref<2xi32, #tpu.memory_space<smem>>
    %c1 = arith.constant 1 : index
    %1 = memref.load %arg1[%c1] : memref<2xi32, #tpu.memory_space<smem>>
    %c16_i32 = arith.constant 16 : i32
    %2 = arith.muli %arg0, %c16_i32 : i32
    %3 = tpu.iota {dimensions = array<i32: 0>} : vector<16x128xi32>
    %4 = tpu.iota {dimensions = array<i32: 1>} : vector<16x128xi32>
    %5 = vector.broadcast %2 : i32 to vector<16x128xi32>
    %6 = arith.addi %5, %3 : vector<16x128xi32>
    %c128_i32 = arith.constant 128 : i32
    %7 = vector.broadcast %c128_i32 : i32 to vector<16x128xi32>
    %8 = arith.muli %6, %7 : vector<16x128xi32>
    %9 = arith.addi %8, %4 : vector<16x128xi32>
    %10 = vector.broadcast %0 : i32 to vector<16x128xi32>
    %11 = arith.xori %9, %10 : vector<16x128xi32>
    %c16_i32_0 = arith.constant 16 : i32
    %12 = vector.broadcast %c16_i32_0 : i32 to vector<16x128xi32>
    %13 = arith.shrui %11, %12 : vector<16x128xi32>
    %14 = arith.xori %11, %13 : vector<16x128xi32>
    %c2146121005_i32 = arith.constant 2146121005 : i32
    %15 = vector.broadcast %c2146121005_i32 : i32 to vector<16x128xi32>
    %16 = arith.muli %14, %15 : vector<16x128xi32>
    %c15_i32 = arith.constant 15 : i32
    %17 = vector.broadcast %c15_i32 : i32 to vector<16x128xi32>
    %18 = arith.shrui %16, %17 : vector<16x128xi32>
    %19 = arith.xori %16, %18 : vector<16x128xi32>
    %c-2073254261_i32 = arith.constant -2073254261 : i32
    %20 = vector.broadcast %c-2073254261_i32 : i32 to vector<16x128xi32>
    %21 = arith.muli %19, %20 : vector<16x128xi32>
    %c16_i32_1 = arith.constant 16 : i32
    %22 = vector.broadcast %c16_i32_1 : i32 to vector<16x128xi32>
    %23 = arith.shrui %21, %22 : vector<16x128xi32>
    %24 = arith.xori %21, %23 : vector<16x128xi32>
    %25 = vector.broadcast %1 : i32 to vector<16x128xi32>
    %26 = arith.cmpi ult, %24, %25 : vector<16x128xi32>
    %c0_2 = arith.constant 0 : index
    %c0_3 = arith.constant 0 : index
    %27 = vector.load %arg2[%c0_2, %c0_3] : memref<16x128xf32, #tpu.memory_space<vmem>>, vector<16x128xf32>
    %cst = arith.constant 0.000000e+00 : f32
    %28 = vector.broadcast %cst : f32 to vector<16x128xf32>
    %29 = arith.select %26, %27, %28 : vector<16x128xi1>, vector<16x128xf32>
    %c0_4 = arith.constant 0 : index
    %c0_5 = arith.constant 0 : index
    %30 = vector.load %arg3[%c0_4, %c0_5] : memref<16x128xf32, #tpu.memory_space<vmem>>, vector<16x128xf32>
    tpu.vector_store %arg3[%c0_4, %c0_5], %29 {strides = array<i32>} : memref<16x128xf32, #tpu.memory_space<vmem>>, vector<16x128xf32>,
    return
  }
  func.func @transform_0(%arg0: i32) -> i32 {
    %c0_i32 = arith.constant 0 : i32
    %c0_i32_0 = arith.constant 0 : i32
    return %c0_i32 : i32
  }
  func.func @transform_1(%arg0: i32) -> (i32, i32) {
    %c0_i32 = arith.constant 0 : i32
    %c0_i32_0 = arith.constant 0 : i32
    return %arg0, %c0_i32 : i32, i32
  }
  func.func @transform_2(%arg0: i32) -> (i32, i32) {
    %c0_i32 = arith.constant 0 : i32
    %c0_i32_0 = arith.constant 0 : i32
    return %arg0, %c0_i32 : i32, i32
  }
}

</mosaic_0001>

<bundles_post_ra>
// kernel: obs_noise_forward.1
= control target key start
LH: loop header
LB: loop body
LE: loop exit
PB: predicated region body
PF: predicated region fallthrough
CT: control target
= control target key end

     0   :  { %7 = vsyncpa [#allocation3], 0  ;;  %s119_s0 = inlined_call_operand.vmem [shape: u32[2], index: 0, kind: input, shape index: {}]   ;;  %s120_s1 = inlined_call_operand.vmem [shape: f32[16,128], index: 1, kind: input, shape index: {}]   ;;  %s121_s2 = inlined_call_operand.vmem [shape: f32[16,128], index: 2, kind: output, shape index: {}]  }
   0x1   :  { %s14_s11 = sshll.u32 %s119_s0, 4  ;;  %s15_s11 = int_to_ptr.vmem [resolvable:$true] %s14_s11 }
   0x2   :  { %s74_s12 = scalar_lea.vmem %s15_s11, 16  ;;  %p79_p1 = scmp.lt.s32.totalorder %s15_s11, %s15_s11 }
   0x3   :  { %p75_p0 = scmp.ne.s32.totalorder %s15_s11, %s74_s12  ;;  %p80_p2 = scmp.lt.s32.totalorder %s74_s12, %s74_s12 }
   0x5   :  { %p81_p3 = por %p80_p2, %p79_p1 }
   0x7   :  { %p82_p4 = pnand %p81_p3, %p75_p0 }
   0x9   :  { %85 = shalt.err (!%p82_p4)
}
   0xa   :  { %s88_s13 = smov [#allocation2]  }
   0xb   :  { %17 = dma.vmem_to_smem %s15_s11, 16, %s88_s13, [#allocation3]  }
   0xc   :  { %86 = dma.done.wait [#allocation3], 16  }
   0xd   :  { %87 = vsyncadd [#allocation3], 4294967280 }
   0xe   :  { %23 = sfence }
   0xf   :  { %s24_s14 = sld [smem:[#allocation2]]  ;;  %v27_v0 = vlaneseq  ;;  %v61_v26 = vld [vmem:[%s120_s1] sm:$0xff]  ;;  %v62_v29 = vld [vmem:[%s120_s1 + $0x8] sm:$0xff] }
  0x10   :  { %s72_s0 = sld [smem:[#allocation2 + $0x1]] }
  0x11   :  { %v28_v1 = vshrl.u32 %v27_v0, 7  ;;  %v31_v2 = vand.u32 127, %v27_v0 }
  0x13   :  { %v35_v3 = vmul.u32 128, %v28_v1  ;;  %v29_v4 = vadd.s32 8, %v28_v1 }
  0x15   :  { %v37_v5 = vadd.s32 %v35_v3, %v31_v2  ;;  %v39_v6 = vstv %s24_s14  ;;  %v36_v7 = vmul.u32 128, %v29_v4 }
  0x16   :  { %v58_v24 = vstv %s72_s0 }
  0x17   :  { %v40_v8 = vxor.u32 %v39_v6, %v37_v5  ;;  %v38_v9 = vadd.s32 %v36_v7, %v31_v2 }
  0x19   :  { %v42_v10 = vshrl.u32 %v40_v8, 16  ;;  %v41_v11 = vxor.u32 %v39_v6, %v38_v9 }
  0x1b   :  { %v44_v12 = vxor.u32 %v42_v10, %v40_v8  ;;  %v43_v13 = vshrl.u32 %v41_v11, 16 }
  0x1d   :  { %v46_v14 = vmul.u32 2146121005, %v44_v12  ;;  %v45_v15 = vxor.u32 %v43_v13, %v41_v11 }
  0x1f   :  { %v48_v16 = vshrl.u32 %v46_v14, 15  ;;  %v47_v17 = vmul.u32 2146121005, %v45_v15 }
  0x21   :  { %v50_v18 = vxor.u32 %v48_v16, %v46_v14  ;;  %v49_v19 = vshrl.u32 %v47_v17, 15 }
  0x23   :  { %v52_v20 = vmul.u32 2221713035, %v50_v18  ;;  %v51_v21 = vxor.u32 %v49_v19, %v47_v17 }
  0x25   :  { %v54_v22 = vshrl.u32 %v52_v20, 16  ;;  %v53_v23 = vmul.u32 2221713035, %v51_v21 }
  0x27   :  { %v56_v25 = vxor.u32 %v54_v22, %v52_v20  ;;  %v55_v27 = vshrl.u32 %v53_v23, 16 }
  0x29   :  { %vm59_vm0 = vcmp.lt.u32.totalorder %v56_v25, %v58_v24  ;;  %v57_v28 = vxor.u32 %v55_v27, %v53_v23 }
  0x2a   :  { %v63_v30 = vsel %vm59_vm0, %v61_v26, 0.0 }
  0x2b   :  { %65 = vst [vmem:[%s121_s2] sm:$0xff] %v63_v30  ;;  %vm60_vm1 = vcmp.lt.u32.totalorder %v57_v28, %v58_v24 }
  0x2c   :  { %v64_v31 = vsel %vm60_vm1, %v62_v29, 0.0 }
  0x2d   :  { %66 = vst [vmem:[%s121_s2 + $0x8] sm:$0xff] %v64_v31 }
  0x2e   :  { %71 = vsyncpa [#allocation3], 1 }

</bundles_post_ra>
